<compile_context>
chip_gen: v6e
topology: v6e:2x2x1
jax: 0.10.0
libtpu: 0.0.40
codegen_flags: <defaults>
</compile_context>

<pallas_src>
import functools

import jax
import jax.numpy as jnp
from jax.experimental import pallas as pl
from jax.experimental.pallas import tpu as pltpu


# ------------------------------ fused kernel --------------------------------

def _fused_gnn_kernel(a_ref, h_ref,
                      w1_ref, b1_ref, w2_ref, b2_ref, w3_ref, b3_ref,
                      w4_ref, b4_ref, w5_ref, b5_ref, wl_ref, bl_ref,
                      o_ref):
    """5x relu(GCN) + linear head, everything resident in VMEM.

    Feature-major layout: h is (F, N); a_ref holds A_hat^T (N, N) in bf16;
    w*_ref hold W^T (F_out, F_in); b*_ref hold biases as (F_out, 1) columns.
    """
    a_t = a_ref[...]                               # (N, N) bf16
    h = h_ref[...].astype(jnp.float32)             # (F_in0, N) f32

    def gcn_layer(h, w_ref, b_ref):
        w_t = w_ref[...]                           # (f_out, f_in) f32
        f_out, f_in = w_t.shape
        if f_in < f_out:
            # Expanding layer (conv1: 2->32): aggregate first -> ~10x fewer MACs.
            h_agg = jnp.dot(h.astype(jnp.bfloat16), a_t,
                            preferred_element_type=jnp.float32)      # (f_in, N)
            z = jnp.dot(w_t, h_agg, preferred_element_type=jnp.float32)
        else:
            # Contracting / square layer: transform first.
            wh = jnp.dot(w_t, h, preferred_element_type=jnp.float32)  # (f_out, N)
            z = jnp.dot(wh.astype(jnp.bfloat16), a_t,
                        preferred_element_type=jnp.float32)
        return jnp.maximum(z + b_ref[...], 0.0)    # bias (f_out,1) lane-broadcast

    h = gcn_layer(h, w1_ref, b1_ref)
    h = gcn_layer(h, w2_ref, b2_ref)
    h = gcn_layer(h, w3_ref, b3_ref)
    h = gcn_layer(h, w4_ref, b4_ref)
    h = gcn_layer(h, w5_ref, b5_ref)

    # Linear head (out_ch -> 1) as a sublane reduce: lane-dense (1, N) output.
    out_row = jnp.sum(h * wl_ref[...], axis=0, keepdims=True) + bl_ref[...]
    o_ref[...] = out_row.astype(o_ref.dtype)


def fused_gnn_add(a_hat_t_bf16, h0, conv_w_t, conv_b_col, w_lin, b_lin):
    n = a_hat_t_bf16.shape[0]
    inputs = [a_hat_t_bf16, h0]
    for w_t, b_c in zip(conv_w_t, conv_b_col):
        inputs.append(w_t)
        inputs.append(b_c)
    inputs.append(w_lin)
    inputs.append(b_lin)
    # All operands are tiny; full-array blocks, single grid step.
    # TODO(synk): for large N, tile A_hat^T / output over row blocks with a
    # "parallel" grid axis (v7x megacore) instead of full-resident blocks.
    return pl.pallas_call(
        _fused_gnn_kernel,
        out_shape=jax.ShapeDtypeStruct((1, n), jnp.float32),
        grid=(1,),
        in_specs=[pl.BlockSpec(v.shape, lambda i: (0, 0)) for v in inputs],
        out_specs=pl.BlockSpec((1, n), lambda i: (0, 0)),
        compiler_params=pltpu.CompilerParams(
            dimension_semantics=("arbitrary",)),
    )(*inputs)


# ----------------------------- Glue (plain JAX) ------------------------------

def build_normalized_adjacency(edge_index, num_nodes):
    """Dense D^-1/2 (A + I) D^-1/2 matching PyG GCNConv's gcn_norm.

    Duplicate edges are counted with multiplicity (scatter-add); explicit
    self-loop edges are dropped and replaced by the unit identity
    (add_remaining_self_loops semantics).
    """
    src, dst = edge_index[0], edge_index[1]
    w = jnp.where(src == dst, 0.0, 1.0).astype(jnp.float32)
    a = jnp.zeros((num_nodes, num_nodes), jnp.float32)
    a = a.at[dst, src].add(w)                       # message flows src -> dst
    a = a + jnp.eye(num_nodes, dtype=jnp.float32)   # self-loops, weight 1
    deg = a.sum(axis=1)
    d_inv_sqrt = jnp.where(deg > 0, 1.0 / jnp.sqrt(deg), 0.0)
    return d_inv_sqrt[:, None] * a * d_inv_sqrt[None, :]


def init_params(key, in_channels, hidden_channels, out_channels):
    h4 = hidden_channels // 4
    dims = [
        (in_channels, hidden_channels),      # conv1
        (hidden_channels, hidden_channels),  # conv2
        (hidden_channels, h4),               # conv3
        (h4, h4),                            # conv4
        (h4, out_channels),                  # conv5
        (out_channels, 1),                   # lin
    ]
    params = []
    keys = jax.random.split(key, len(dims))
    for k, (fi, fo) in zip(keys, dims):
        kw, kb = jax.random.split(k)
        scale = 1.0 / jnp.sqrt(jnp.float32(fi))
        w = jax.random.normal(kw, (fi, fo), jnp.float32) * scale
        b = jax.random.normal(kb, (fo,), jnp.float32) * 0.01
        params.append((w, b))
    return params


@functools.partial(jax.jit, static_argnums=(2,))
def gnn_add_forward(x, edge_index, batch_size, params):
    x = x.reshape(-1, 2).astype(jnp.float32)        # x.view(-1, 2)
    n = x.shape[0]

    a_hat = build_normalized_adjacency(edge_index, n)
    a_hat_t = a_hat.T.astype(jnp.bfloat16)          # kernel uses A_hat^T (bf16)
    h0 = x.T                                        # feature-major (F_in, N)

    conv_w_t = [w.T for (w, _) in params[:5]]       # (F_out, F_in)
    conv_b_c = [b.reshape(-1, 1) for (_, b) in params[:5]]
    w_lin, b_lin = params[5]                        # (out_ch, 1), (1,)

    out_row = fused_gnn_add(a_hat_t, h0, conv_w_t, conv_b_c,
                            w_lin, b_lin.reshape(1, 1))   # (1, N)
    return out_row.reshape(batch_size, -1)          # x.view(batch_size, -1)


# ---------------------------------- main -------------------------------------

if __name__ == "__main__":
    key = jax.random.PRNGKey(0)
    k_x, k_e, k_p = jax.random.split(key, 3)

    N = 64            # total number of nodes
    E = 128           # number of edges
    IN_CH = 2         # forced by x.view(-1, 2)
    HIDDEN = 32
    OUT_CH = 8
    BATCH = 2

    x = jax.random.normal(k_x, (N, IN_CH), jnp.float32)
    edge_index = jax.random.randint(k_e, (2, E), 0, N, dtype=jnp.int32)
    params = init_params(k_p, IN_CH, HIDDEN, OUT_CH)

    out = gnn_add_forward(x, edge_index, BATCH, params)
    out = jax.block_until_ready(out)
    assert out.shape == (BATCH, N // BATCH), out.shape
    assert bool(jnp.all(jnp.isfinite(out)))
    print("KERNEL_OK")
</pallas_src>

<mosaic_0001>
module attributes {stable_mosaic.version = 11 : i64} {
  func.func private @main(%arg0: i32) attributes {dimension_semantics = [#tpu.dimension_semantics<core_parallel>], iteration_bounds = array<i64: 2>, tpu.core_type = #tpu.core_type<sc_scalar_subcore>, window_params = []} {
    return
  }
}

module attributes {stable_mosaic.version = 11 : i64} {
  func.func private @main(%arg0: i32) attributes {dimension_semantics = [#tpu.dimension_semantics<core_parallel>], iteration_bounds = array<i64: 2>, tpu.core_type = #tpu.core_type<sc_scalar_subcore>, window_params = []} {
    return
  }
}

module attributes {stable_mosaic.version = 11 : i64} {
  func.func @_fused_gnn_kernel(%arg0: i32, %arg1: memref<64x64xbf16, #tpu.memory_space<vmem>>, %arg2: memref<2x64xf32, #tpu.memory_space<vmem>>, %arg3: memref<32x2xf32, #tpu.memory_space<vmem>>, %arg4: memref<32x1xf32, #tpu.memory_space<vmem>>, %arg5: memref<32x32xf32, #tpu.memory_space<vmem>>, %arg6: memref<32x1xf32, #tpu.memory_space<vmem>>, %arg7: memref<8x32xf32, #tpu.memory_space<vmem>>, %arg8: memref<8x1xf32, #tpu.memory_space<vmem>>, %arg9: memref<8x8xf32, #tpu.memory_space<vmem>>, %arg10: memref<8x1xf32, #tpu.memory_space<vmem>>, %arg11: memref<8x8xf32, #tpu.memory_space<vmem>>, %arg12: memref<8x1xf32, #tpu.memory_space<vmem>>, %arg13: memref<8x1xf32, #tpu.memory_space<vmem>>, %arg14: memref<1x1xf32, #tpu.memory_space<vmem>>, %arg15: memref<1x64xf32, #tpu.memory_space<vmem>>) attributes {dimension_semantics = [#tpu.dimension_semantics<arbitrary>], iteration_bounds = array<i64: 1>, scalar_prefetch = 0 : i64, scratch_operands = 0 : i64, tpu.core_type = #tpu.core_type<tc>, window_params = [{pipeline_mode = #tpu.pipeline_mode<synchronous>, transform_indices = @transform_0, window_bounds = array<i64: 64, 64>}, {pipeline_mode = #tpu.pipeline_mode<synchronous>, transform_indices = @transform_1, window_bounds = array<i64: 2, 64>}, {pipeline_mode = #tpu.pipeline_mode<synchronous>, transform_indices = @transform_2, window_bounds = array<i64: 32, 2>}, {pipeline_mode = #tpu.pipeline_mode<synchronous>, transform_indices = @transform_3, window_bounds = array<i64: 32, 1>}, {pipeline_mode = #tpu.pipeline_mode<synchronous>, transform_indices = @transform_4, window_bounds = array<i64: 32, 32>}, {pipeline_mode = #tpu.pipeline_mode<synchronous>, transform_indices = @transform_5, window_bounds = array<i64: 32, 1>}, {pipeline_mode = #tpu.pipeline_mode<synchronous>, transform_indices = @transform_6, window_bounds = array<i64: 8, 32>}, {pipeline_mode = #tpu.pipeline_mode<synchronous>, transform_indices = @transform_7, window_bounds = array<i64: 8, 1>}, {pipeline_mode = #tpu.pipeline_mode<synchronous>, transform_indices = @transform_8, window_bounds = array<i64: 8, 8>}, {pipeline_mode = #tpu.pipeline_mode<synchronous>, transform_indices = @transform_9, window_bounds = array<i64: 8, 1>}, {pipeline_mode = #tpu.pipeline_mode<synchronous>, transform_indices = @transform_10, window_bounds = array<i64: 8, 8>}, {pipeline_mode = #tpu.pipeline_mode<synchronous>, transform_indices = @transform_11, window_bounds = array<i64: 8, 1>}, {pipeline_mode = #tpu.pipeline_mode<synchronous>, transform_indices = @transform_12, window_bounds = array<i64: 8, 1>}, {pipeline_mode = #tpu.pipeline_mode<synchronous>, transform_indices = @transform_13, window_bounds = array<i64: 1, 1>}, {pipeline_mode = #tpu.pipeline_mode<synchronous>, transform_indices = @transform_14, window_bounds = array<i64: 1, 64>}]} {
    %c0 = arith.constant 0 : index
    %c0_0 = arith.constant 0 : index
    %0 = vector.load %arg1[%c0, %c0_0] : memref<64x64xbf16, #tpu.memory_space<vmem>>, vector<64x64xbf16>
    %c0_1 = arith.constant 0 : index
    %c0_2 = arith.constant 0 : index
    %1 = vector.load %arg2[%c0_1, %c0_2] : memref<2x64xf32, #tpu.memory_space<vmem>>, vector<2x64xf32>
    %c0_3 = arith.constant 0 : index
    %c0_4 = arith.constant 0 : index
    %2 = vector.load %arg3[%c0_3, %c0_4] : memref<32x2xf32, #tpu.memory_space<vmem>>, vector<32x2xf32>
    %3 = arith.truncf %1 : vector<2x64xf32> to vector<2x64xbf16>
    %cst = arith.constant dense<0.000000e+00> : vector<2x64xf32>
    %4 = tpu.matmul %3, %0, %cst {dimension_numbers = #tpu.dot_dimension_numbers<[1], [0], [0], [1], [0, 0, 1, 1], [], []>} : vector<2x64xbf16>, vector<64x64xbf16>, vector<2x64xf32> -> vector<2x64xf32>
    %cst_5 = arith.constant dense<0.000000e+00> : vector<32x64xf32>
    %5 = tpu.matmul %2, %4, %cst_5 {dimension_numbers = #tpu.dot_dimension_numbers<[1], [0], [0], [1], [0, 0, 1, 1], [], []>} : vector<32x2xf32>, vector<2x64xf32>, vector<32x64xf32> -> vector<32x64xf32>
    %c0_6 = arith.constant 0 : index
    %c0_7 = arith.constant 0 : index
    %6 = vector.load %arg4[%c0_6, %c0_7] : memref<32x1xf32, #tpu.memory_space<vmem>>, vector<32x1xf32>
    %7 = vector.broadcast %6 : vector<32x1xf32> to vector<32x64xf32>
    %8 = arith.addf %5, %7 : vector<32x64xf32>
    %cst_8 = arith.constant 0.000000e+00 : f32
    %9 = vector.broadcast %cst_8 : f32 to vector<32x64xf32>
    %10 = arith.maximumf %8, %9 : vector<32x64xf32>
    %c0_9 = arith.constant 0 : index
    %c0_10 = arith.constant 0 : index
    %11 = vector.load %arg5[%c0_9, %c0_10] : memref<32x32xf32, #tpu.memory_space<vmem>>, vector<32x32xf32>
    %cst_11 = arith.constant dense<0.000000e+00> : vector<32x64xf32>
    %12 = tpu.matmul %11, %10, %cst_11 {dimension_numbers = #tpu.dot_dimension_numbers<[1], [0], [0], [1], [0, 0, 1, 1], [], []>} : vector<32x32xf32>, vector<32x64xf32>, vector<32x64xf32> -> vector<32x64xf32>
    %13 = arith.truncf %12 : vector<32x64xf32> to vector<32x64xbf16>
    %cst_12 = arith.constant dense<0.000000e+00> : vector<32x64xf32>
    %14 = tpu.matmul %13, %0, %cst_12 {dimension_numbers = #tpu.dot_dimension_numbers<[1], [0], [0], [1], [0, 0, 1, 1], [], []>} : vector<32x64xbf16>, vector<64x64xbf16>, vector<32x64xf32> -> vector<32x64xf32>
    %c0_13 = arith.constant 0 : index
    %c0_14 = arith.constant 0 : index
    %15 = vector.load %arg6[%c0_13, %c0_14] : memref<32x1xf32, #tpu.memory_space<vmem>>, vector<32x1xf32>
    %16 = vector.broadcast %15 : vector<32x1xf32> to vector<32x64xf32>
    %17 = arith.addf %14, %16 : vector<32x64xf32>
    %cst_15 = arith.constant 0.000000e+00 : f32
    %18 = vector.broadcast %cst_15 : f32 to vector<32x64xf32>
    %19 = arith.maximumf %17, %18 : vector<32x64xf32>
    %c0_16 = arith.constant 0 : index
    %c0_17 = arith.constant 0 : index
    %20 = vector.load %arg7[%c0_16, %c0_17] : memref<8x32xf32, #tpu.memory_space<vmem>>, vector<8x32xf32>
    %cst_18 = arith.constant dense<0.000000e+00> : vector<8x64xf32>
    %21 = tpu.matmul %20, %19, %cst_18 {dimension_numbers = #tpu.dot_dimension_numbers<[1], [0], [0], [1], [0, 0, 1, 1], [], []>} : vector<8x32xf32>, vector<32x64xf32>, vector<8x64xf32> -> vector<8x64xf32>
    %22 = arith.truncf %21 : vector<8x64xf32> to vector<8x64xbf16>
    %cst_19 = arith.constant dense<0.000000e+00> : vector<8x64xf32>
    %23 = tpu.matmul %22, %0, %cst_19 {dimension_numbers = #tpu.dot_dimension_numbers<[1], [0], [0], [1], [0, 0, 1, 1], [], []>} : vector<8x64xbf16>, vector<64x64xbf16>, vector<8x64xf32> -> vector<8x64xf32>
    %c0_20 = arith.constant 0 : index
    %c0_21 = arith.constant 0 : index
    %24 = vector.load %arg8[%c0_20, %c0_21] : memref<8x1xf32, #tpu.memory_space<vmem>>, vector<8x1xf32>
    %25 = vector.broadcast %24 : vector<8x1xf32> to vector<8x64xf32>
    %26 = arith.addf %23, %25 : vector<8x64xf32>
    %cst_22 = arith.constant 0.000000e+00 : f32
    %27 = vector.broadcast %cst_22 : f32 to vector<8x64xf32>
    %28 = arith.maximumf %26, %27 : vector<8x64xf32>
    %c0_23 = arith.constant 0 : index
    %c0_24 = arith.constant 0 : index
    %29 = vector.load %arg9[%c0_23, %c0_24] : memref<8x8xf32, #tpu.memory_space<vmem>>, vector<8x8xf32>
    %cst_25 = arith.constant dense<0.000000e+00> : vector<8x64xf32>
    %30 = tpu.matmul %29, %28, %cst_25 {dimension_numbers = #tpu.dot_dimension_numbers<[1], [0], [0], [1], [0, 0, 1, 1], [], []>} : vector<8x8xf32>, vector<8x64xf32>, vector<8x64xf32> -> vector<8x64xf32>
    %31 = arith.truncf %30 : vector<8x64xf32> to vector<8x64xbf16>
    %cst_26 = arith.constant dense<0.000000e+00> : vector<8x64xf32>
    %32 = tpu.matmul %31, %0, %cst_26 {dimension_numbers = #tpu.dot_dimension_numbers<[1], [0], [0], [1], [0, 0, 1, 1], [], []>} : vector<8x64xbf16>, vector<64x64xbf16>, vector<8x64xf32> -> vector<8x64xf32>
    %c0_27 = arith.constant 0 : index
    %c0_28 = arith.constant 0 : index
    %33 = vector.load %arg10[%c0_27, %c0_28] : memref<8x1xf32, #tpu.memory_space<vmem>>, vector<8x1xf32>
    %34 = vector.broadcast %33 : vector<8x1xf32> to vector<8x64xf32>
    %35 = arith.addf %32, %34 : vector<8x64xf32>
    %cst_29 = arith.constant 0.000000e+00 : f32
    %36 = vector.broadcast %cst_29 : f32 to vector<8x64xf32>
    %37 = arith.maximumf %35, %36 : vector<8x64xf32>
    %c0_30 = arith.constant 0 : index
    %c0_31 = arith.constant 0 : index
    %38 = vector.load %arg11[%c0_30, %c0_31] : memref<8x8xf32, #tpu.memory_space<vmem>>, vector<8x8xf32>
    %cst_32 = arith.constant dense<0.000000e+00> : vector<8x64xf32>
    %39 = tpu.matmul %38, %37, %cst_32 {dimension_numbers = #tpu.dot_dimension_numbers<[1], [0], [0], [1], [0, 0, 1, 1], [], []>} : vector<8x8xf32>, vector<8x64xf32>, vector<8x64xf32> -> vector<8x64xf32>
    %40 = arith.truncf %39 : vector<8x64xf32> to vector<8x64xbf16>
    %cst_33 = arith.constant dense<0.000000e+00> : vector<8x64xf32>
    %41 = tpu.matmul %40, %0, %cst_33 {dimension_numbers = #tpu.dot_dimension_numbers<[1], [0], [0], [1], [0, 0, 1, 1], [], []>} : vector<8x64xbf16>, vector<64x64xbf16>, vector<8x64xf32> -> vector<8x64xf32>
    %c0_34 = arith.constant 0 : index
    %c0_35 = arith.constant 0 : index
    %42 = vector.load %arg12[%c0_34, %c0_35] : memref<8x1xf32, #tpu.memory_space<vmem>>, vector<8x1xf32>
    %43 = vector.broadcast %42 : vector<8x1xf32> to vector<8x64xf32>
    %44 = arith.addf %41, %43 : vector<8x64xf32>
    %cst_36 = arith.constant 0.000000e+00 : f32
    %45 = vector.broadcast %cst_36 : f32 to vector<8x64xf32>
    %46 = arith.maximumf %44, %45 : vector<8x64xf32>
    %c0_37 = arith.constant 0 : index
    %c0_38 = arith.constant 0 : index
    %47 = vector.load %arg13[%c0_37, %c0_38] : memref<8x1xf32, #tpu.memory_space<vmem>>, vector<8x1xf32>
    %48 = vector.broadcast %47 : vector<8x1xf32> to vector<8x64xf32>
    %49 = arith.mulf %46, %48 : vector<8x64xf32>
    %cst_39 = arith.constant dense<0.000000e+00> : vector<64xf32>
    %50 = vector.multi_reduction <add>, %49, %cst_39 [0] : vector<8x64xf32> to vector<64xf32>
    %51 = vector.shape_cast %50 : vector<64xf32> to vector<1x64xf32>
    %c0_40 = arith.constant 0 : index
    %c0_41 = arith.constant 0 : index
    %52 = vector.load %arg14[%c0_40, %c0_41] : memref<1x1xf32, #tpu.memory_space<vmem>>, vector<1x1xf32>
    %53 = vector.broadcast %52 : vector<1x1xf32> to vector<1x64xf32>
    %54 = arith.addf %51, %53 : vector<1x64xf32>
    %c0_42 = arith.constant 0 : index
    %c0_43 = arith.constant 0 : index
    %55 = vector.load %arg15[%c0_42, %c0_43] : memref<1x64xf32, #tpu.memory_space<vmem>>, vector<1x64xf32>
    tpu.vector_store %arg15[%c0_42, %c0_43], %54 {strides = array<i32>} : memref<1x64xf32, #tpu.memory_space<vmem>>, vector<1x64xf32>,
    return
  }
  func.func @transform_0(%arg0: i32) -> (i32, i32) {
    %c0_i32 = arith.constant 0 : i32
    %c0_i32_0 = arith.constant 0 : i32
    %c0_i32_1 = arith.constant 0 : i32
    return %c0_i32, %c0_i32_0 : i32, i32
  }
  func.func @transform_1(%arg0: i32) -> (i32, i32) {
    %c0_i32 = arith.constant 0 : i32
    %c0_i32_0 = arith.constant 0 : i32
    %c0_i32_1 = arith.constant 0 : i32
    return %c0_i32, %c0_i32_0 : i32, i32
  }
  func.func @transform_2(%arg0: i32) -> (i32, i32) {
    %c0_i32 = arith.constant 0 : i32
    %c0_i32_0 = arith.constant 0 : i32
    %c0_i32_1 = arith.constant 0 : i32
    return %c0_i32, %c0_i32_0 : i32, i32
  }
  func.func @transform_3(%arg0: i32) -> (i32, i32) {
    %c0_i32 = arith.constant 0 : i32
    %c0_i32_0 = arith.constant 0 : i32
    %c0_i32_1 = arith.constant 0 : i32
    return %c0_i32, %c0_i32_0 : i32, i32
  }
  func.func @transform_4(%arg0: i32) -> (i32, i32) {
    %c0_i32 = arith.constant 0 : i32
    %c0_i32_0 = arith.constant 0 : i32
    %c0_i32_1 = arith.constant 0 : i32
    return %c0_i32, %c0_i32_0 : i32, i32
  }
  func.func @transform_5(%arg0: i32) -> (i32, i32) {
    %c0_i32 = arith.constant 0 : i32
    %c0_i32_0 = arith.constant 0 : i32
    %c0_i32_1 = arith.constant 0 : i32
    return %c0_i32, %c0_i32_0 : i32, i32
  }
  func.func @transform_6(%arg0: i32) -> (i32, i32) {
    %c0_i32 = arith.constant 0 : i32
    %c0_i32_0 = arith.constant 0 : i32
    %c0_i32_1 = arith.constant 0 : i32
    return %c0_i32, %c0_i32_0 : i32, i32
  }
  func.func @transform_7(%arg0: i32) -> (i32, i32) {
    %c0_i32 = arith.constant 0 : i32
    %c0_i32_0 = arith.constant 0 : i32
    %c0_i32_1 = arith.constant 0 : i32
    return %c0_i32, %c0_i32_0 : i32, i32
  }
  func.func @transform_8(%arg0: i32) -> (i32, i32) {
    %c0_i32 = arith.constant 0 : i32
    %c0_i32_0 = arith.constant 0 : i32
    %c0_i32_1 = arith.constant 0 : i32
    return %c0_i32, %c0_i32_0 : i32, i32
  }
  func.func @transform_9(%arg0: i32) -> (i32, i32) {
    %c0_i32 = arith.constant 0 : i32
    %c0_i32_0 = arith.constant 0 : i32
    %c0_i32_1 = arith.constant 0 : i32
    return %c0_i32, %c0_i32_0 : i32, i32
  }
  func.func @transform_10(%arg0: i32) -> (i32, i32) {
    %c0_i32 = arith.constant 0 : i32
    %c0_i32_0 = arith.constant 0 : i32
    %c0_i32_1 = arith.constant 0 : i32
    return %c0_i32, %c0_i32_0 : i32, i32
  }
  func.func @transform_11(%arg0: i32) -> (i32, i32) {
    %c0_i32 = arith.constant 0 : i32
    %c0_i32_0 = arith.constant 0 : i32
    %c0_i32_1 = arith.constant 0 : i32
    return %c0_i32, %c0_i32_0 : i32, i32
  }
  func.func @transform_12(%arg0: i32) -> (i32, i32) {
    %c0_i32 = arith.constant 0 : i32
    %c0_i32_0 = arith.constant 0 : i32
    %c0_i32_1 = arith.constant 0 : i32
    return %c0_i32, %c0_i32_0 : i32, i32
  }
  func.func @transform_13(%arg0: i32) -> (i32, i32) {
    %c0_i32 = arith.constant 0 : i32
    %c0_i32_0 = arith.constant 0 : i32
    %c0_i32_1 = arith.constant 0 : i32
    return %c0_i32, %c0_i32_0 : i32, i32
  }
  func.func @transform_14(%arg0: i32) -> (i32, i32) {
    %c0_i32 = arith.constant 0 : i32
    %c0_i32_0 = arith.constant 0 : i32
    %c0_i32_1 = arith.constant 0 : i32
    return %c0_i32, %c0_i32_0 : i32, i32
  }
}

</mosaic_0001>

<bundles_post_ra>
// kernel: gnn_add_forward.1
= control target key start
LH: loop header
LB: loop body
LE: loop exit
PB: predicated region body
PF: predicated region fallthrough
CT: control target
= control target key end

     0   :  { %v1038_v0 = vmov 0.0   ;;  %vm1039_vm0 = vmmov 0   ;;  %vm88_vm1 = vcmask 523264   ;;  %vm156_vm2 = vcmask 15360   ;;  %s1292_s0 = inlined_call_operand.vmem [shape: bf16[64,64], index: 0, kind: input, shape index: {}]   ;;  %s1293_s1 = inlined_call_operand.vmem [shape: f32[2,64], index: 1, kind: input, shape index: {}]   ;;  %s1294_s2 = inlined_call_operand.vmem [shape: f32[32,2], index: 2, kind: input, shape index: {}]   ;;  %s1295_s3 = inlined_call_operand.vmem [shape: f32[32,1], index: 3, kind: input, shape index: {}]   ;;  %s1296_s13 = inlined_call_operand.<no memory space> [shape: f32[1,1], index: 13, kind: input, shape index: {}]   ;;  %s1297_s5 = inlined_call_operand.vmem [shape: f32[32,1], index: 5, kind: input, shape index: {}]   ;;  %s1298_s7 = inlined_call_operand.vmem [shape: f32[8,1], index: 7, kind: input, shape index: {}]   ;;  %s1299_s9 = inlined_call_operand.vmem [shape: f32[8,1], index: 9, kind: input, shape index: {}]   ;;  %s1300_s11 = inlined_call_operand.vmem [shape: f32[8,1], index: 11, kind: input, shape index: {}]   ;;  %s1301_s12 = inlined_call_operand.vmem [shape: f32[8,1], index: 12, kind: input, shape index: {}]   ;;  %s1302_s4 = inlined_call_operand.vmem [shape: f32[32,32], index: 4, kind: input, shape index: {}]   ;;  %s1303_s6 = inlined_call_operand.vmem [shape: f32[8,32], index: 6, kind: input, shape index: {}]   ;;  %s1304_s8 = inlined_call_operand.vmem [shape: f32[8,8], index: 8, kind: input, shape index: {}]   ;;  %s1305_s10 = inlined_call_operand.vmem [shape: f32[8,8], index: 10, kind: input, shape index: {}]   ;;  %s1306_s14 = inlined_call_operand.vmem [shape: f32[1,64], index: 14, kind: output, shape index: {}]  }
   0x1   :  { %926 = vmatprep.subr.bf16.mxu0 %v1038_v0  ;;  %v1120_v1 = vld [vmem:[%s1292_s0 + $0x18] sm:$0xff]   ;;  %934 = vmatprep.mubr.msk.bf16.mxu0 %vm1039_vm0, %v1038_v0  ;;  %v1128_v2 = vld [vmem:[%s1292_s0 + $0x10] sm:$0xff]   ;;  %v1135_v3 = vld [vmem:[%s1292_s0 + $0x8] sm:$0xff]   ;;  %v1040_v8 = vmov 0   ;;  %v19_v10 = vstv %s1296_s13  ;;  %vm169_vm3 = vcmask 1041408   ;;  %vm266_vm4 = vcmask 261120  }
   0x2   :  { %927 = vmatpush3.bf16.msra.mxu0 %v1120_v1  ;;  %v1142_v4 = vld [vmem:[%s1292_s0] sm:$0xff]   ;;  %1032 = vset.pattern.permute.xlu0 %v1040_v8  ;;  %v135_v9 = vld [vmem:[%s1295_s3 + $0x18] sm:$0xff]  ;;  %v133_v11 = vld [vmem:[%s1295_s3 + $0x8] sm:$0xff]  ;;  %20 = vst [vmem:[#allocation2] sm:$0x1] %v19_v10  ;;  %vm575_vm5 = vcmask 64512  }
   0x3   :  { %928 = vmatprep.subr.bf16.mxu0 %v1038_v0  ;;  %v58_v5 = vld [vmem:[%s1293_s1] sm:$0x3]  ;;  %1033 = vset.pattern.permute.xlu1 %v1040_v8  ;;  %v134_v12 = vld [vmem:[%s1295_s3 + $0x10] sm:$0xff]  ;;  %v369_v14 = vld [vmem:[%s1297_s5 + $0x18] sm:$0xff]  ;;  %vm850_vm6 = vcmask 516096  }
   0x4   :  { %v63_v6 = vpack.c.bf16 %v58_v5, %v58_v5  ;;  %v59_v7 = vld [vmem:[%s1294_s2] sm:$0xff]  ;;  %153 = vperm.xlu0 %1032, %v135_v9   ;;  %143 = vperm.xlu1 %1033, %v133_v11   ;;  %v368_v15 = vld [vmem:[%s1297_s5 + $0x10] sm:$0xff]  ;;  %v367_v16 = vld [vmem:[%s1297_s5 + $0x8] sm:$0xff] }
   0x5   :  { %940 = vmatprep.mubr.msk.f32.mxu1 %vm156_vm2, %v59_v7  ;;  %v132_v13 = vld [vmem:[%s1295_s3] sm:$0xff]  ;;  %v60_v24 = vld [vmem:[%s1294_s2 + $0x8] sm:$0xff]  ;;  %v61_v25 = vld [vmem:[%s1294_s2 + $0x10] sm:$0xff] }
   0x6   :  { %929 = vmatpush3.bf16.msra.mxu0 %v1128_v2  ;;  %v366_v17 = vld [vmem:[%s1297_s5] sm:$0xff]  ;;  %v62_v28 = vld [vmem:[%s1294_s2 + $0x18] sm:$0xff]  ;;  %v263_v47 = vld [vmem:[%s1302_s4 + $0x8] sm:$0xff] }
   0x7   :  { %930 = vmatprep.subr.bf16.mxu0 %v1038_v0  ;;  %v524_v18 = vld [vmem:[%s1298_s7] sm:$0xff]  ;;  %v264_v48 = vld [vmem:[%s1302_s4 + $0x10] sm:$0xff]  ;;  %v265_v49 = vld [vmem:[%s1302_s4 + $0x18] sm:$0xff] }
   0x8   :  { %148 = vperm.xlu0 %1032, %v134_v12   ;;  %138 = vperm.xlu1 %1033, %v132_v13   ;;  %v650_v19 = vld [vmem:[%s1299_s9] sm:$0xff] }
   0x9   :  { %v775_v20 = vld [vmem:[%s1300_s11] sm:$0xff] }
   0xa   :  { %931 = vmatpush3.bf16.msra.mxu0 %v1135_v3  ;;  %v825_v21 = vld [vmem:[%s1301_s12] sm:$0xff] }
   0xb   :  { %932 = vmatprep.subr.bf16.mxu0 %v1038_v0  ;;  %v839_v22 = vld [vmem:[#allocation2] sm:$0x1] }
   0xc   :  { %387 = vperm.xlu0 %1032, %v369_v14   ;;  %382 = vperm.xlu1 %1033, %v368_v15   ;;  %v262_v30 = vld [vmem:[%s1302_s4] sm:$0xff] }
   0xd   :  { %v449_v13 = vld [vmem:[%s1303_s6] sm:$0xff] }
   0xe   :  { %933 = vmatpush3.bf16.msra.mxu0 %v1142_v4 }
   0xf   :  { %983 = vmatprep.subr.bf16.mxu0 %v1038_v0 }
  0x10   :  { %377 = vperm.xlu0 %1032, %v367_v16   ;;  %372 = vperm.xlu1 %1033, %v366_v17  }
  0x11   :  { %935 = vmatmul.mubr.msk.bf16.vlgmr.msra.gmra.mxu0 %vm88_vm1, %v63_v6 }
  0x12   :  { %984 = vmatpush3.bf16.msra.mxu0 %v1120_v1  ;;  %991 = vmatprep.mubr.msk.bf16.mxu0 %vm1039_vm0, %v1038_v0 }
  0x13   :  { %985 = vmatprep.subr.bf16.mxu0 %v1038_v0 }
  0x14   :  { %527 = vperm.xlu0 %1032, %v524_v18   ;;  %653 = vperm.xlu1 %1033, %v650_v19  }
  0x16   :  { %986 = vmatpush3.bf16.msra.mxu0 %v1128_v2 }
  0x17   :  { %987 = vmatprep.subr.bf16.mxu0 %v1038_v0 }
  0x18   :  { %778 = vperm.xlu0 %1032, %v775_v20   ;;  %828 = vperm.xlu1 %1033, %v825_v21  }
  0x1a   :  { %988 = vmatpush3.bf16.msra.mxu0 %v1135_v3 }
  0x1b   :  { %989 = vmatprep.subr.bf16.mxu0 %v1038_v0 }
  0x1c   :  { %842 = vperm.xlu0 %1032, %v839_v22   ;;  %v574_v22 = vld [vmem:[%s1304_s8] sm:$0xff] }
  0x1e   :  { %990 = vmatpush3.bf16.msra.mxu0 %v1142_v4 }
  0x1f   :  { %1012 = vmatprep.subr.mxu0 %v1038_v0 }
  0x7f   :  { %v154_v31 = vpop.permute.xlu0 %153  ;;  %v144_v33 = vpop.permute.xlu1 %143 }
  0x83   :  { %v149_v37 = vpop.permute.xlu0 %148  ;;  %v139_v42 = vpop.permute.xlu1 %138 }
  0x87   :  { %v388_v56 = vpop.permute.xlu0 %387  ;;  %v383_v58 = vpop.permute.xlu1 %382 }
  0x8b   :  { %v378_v63 = vpop.permute.xlu0 %377  ;;  %v373_v8 = vpop.permute.xlu1 %372 }
  0x8f   :  { %v528_v17 = vpop.permute.xlu0 %527 }
  0xd1   :  { %v126_v23 = vpop.f32.mrf.mxu0 }
  0xd2   :  { %938 = vmatprep.subr.msk.mxu1 %vm169_vm3, %v126_v23 }
  0xd3   :  { %v936_v26 = vpop.f32.mrf.mxu0  ;;  %939 = vmatpush3.msk.msra.mxu1 %vm169_vm3, %v126_v23 }
  0xd4   :  { %941 = vmatmul.mubr.msk.f32.vlgmr.msra.gmra.mxu1 %vm156_vm2, %v60_v24 }
  0xd5   :  { %v129_v27 = vpop.f32.mrf.mxu0  ;;  %943 = vmatprep.mubr.msk.f32.mxu1 %vm156_vm2, %v61_v25 }
  0xd7   :  { %v937_v29 = vpop.f32.mrf.mxu0 }
  0xd8   :  { %944 = vmatmul.mubr.msk.f32.gmra.mxu1 %vm156_vm2, %v62_v28  ;;  %v654_v28 = vpop.permute.xlu1 %653 }
  0xd9   :  { %954 = vmatprep.mubr.msk.f32.mxu1 %vm266_vm4, %v262_v30 }
 0x194   :  { %v942_v32 = vpop.f32.mrf.mxu1 }
 0x195   :  { %v245_v39 = vadd.f32 %v942_v32, %v144_v33  ;;  %v700_v33 = vld [vmem:[%s1305_s10] sm:$0xff] }
 0x196   :  { %v239_v34 = vpop.f32.mrf.mxu1 }
 0x197   :  { %v240_v43 = vadd.f32 %v239_v34, %v139_v42  ;;  %v259_v45 = vmax.f32 %v245_v39, 0.0 }
 0x198   :  { %v945_v35 = vpop.f32.mrf.mxu1 }
 0x199   :  { %v255_v36 = vadd.f32 %v945_v35, %v154_v31  ;;  %v258_v46 = vmax.f32 %v240_v43, 0.0  ;;  %v829_v43 = vpop.permute.xlu1 %828 }
 0x19a   :  { %v249_v38 = vpop.f32.mrf.mxu1 }
 0x19b   :  { %v261_v40 = vmax.f32 %v255_v36, 0.0  ;;  %v250_v41 = vadd.f32 %v249_v38, %v149_v37 }
 0x19d   :  { %v260_v44 = vmax.f32 %v250_v41, 0.0  ;;  %946 = vmatprep.subr.mxu1 %v261_v40 }
 0x19e   :  { %947 = vmatpush3.msra.mxu1 %v261_v40 }
 0x19f   :  { %948 = vmatprep.subr.mxu1 %v260_v44 }
 0x1a0   :  { %949 = vmatpush3.msra.mxu1 %v260_v44 }
 0x1a1   :  { %950 = vmatprep.subr.mxu1 %v259_v45 }
 0x1a2   :  { %951 = vmatpush3.msra.mxu1 %v259_v45  ;;  %v845_v45 = vlaneseq }
 0x1a3   :  { %952 = vmatprep.subr.mxu1 %v258_v46 }
 0x1a4   :  { %953 = vmatpush3.msra.mxu1 %v258_v46 }
 0x1a5   :  { %955 = vmatmul.mubr.msk.f32.vlgmr.msra.gmra.mxu1 %vm266_vm4, %v263_v47  ;;  %960 = vmatprep.subr.bf16.mxu1 %v1120_v1  ;;  %v846_v47 = vshrl.u32 %v845_v45, 7 }
 0x1a6   :  { %957 = vmatprep.mubr.msk.f32.mxu1 %vm266_vm4, %v264_v48  ;;  %961 = vmatpush3.bf16.msra.mxu1 %v1120_v1 }
 0x1a7   :  { %962 = vmatprep.subr.bf16.mxu1 %v1128_v2 }
 0x1a9   :  { %958 = vmatmul.mubr.msk.f32.gmra.mxu1 %vm266_vm4, %v265_v49  ;;  %v847_v49 = vsub.s32 0, %v846_v47 }
 0x1aa   :  { %963 = vmatpush3.bf16.msra.mxu1 %v1128_v2 }
 0x1ab   :  { %964 = vmatprep.subr.bf16.mxu1 %v1135_v3 }
 0x1ae   :  { %965 = vmatpush3.bf16.msra.mxu1 %v1135_v3 }
 0x1af   :  { %966 = vmatprep.subr.bf16.mxu1 %v1142_v4 }
 0x1b2   :  { %967 = vmatpush3.bf16.msra.mxu1 %v1142_v4 }
 0x1b3   :  { %972 = vmatprep.subr.mxu1 %v1038_v0 }
 0x265   :  { %v956_v50 = vpop.f32.mrf.mxu1 }
 0x267   :  { %v345_v51 = vpop.f32.mrf.mxu1 }
 0x268   :  { %v364_v52 = vpack.c.bf16 %v956_v50, %v345_v51 }
 0x269   :  { %v959_v53 = vpop.f32.mrf.mxu1 }
 0x26a   :  { %968 = vmatprep.mubr.msk.bf16.mxu1 %vm88_vm1, %v364_v52 }
 0x26b   :  { %v355_v54 = vpop.f32.mrf.mxu1 }
 0x26c   :  { %v365_v55 = vpack.c.bf16 %v959_v53, %v355_v54 }
 0x26e   :  { %969 = vmatmul.mubr.msk.bf16.vlgmr.msra.gmra.mxu1 %vm88_vm1, %v365_v55 }
 0x26f   :  { %980 = vmatprep.mubr.msk.f32.mxu1 %vm1039_vm0, %v1038_v0 }
 0x32e   :  { %v970_v57 = vpop.f32.mrf.mxu1 }
 0x32f   :  { %v439_v61 = vadd.f32 %v970_v57, %v383_v58 }
 0x330   :  { %v430_v59 = vpop.f32.mrf.mxu1 }
 0x331   :  { %v447_v9 = vmax.f32 %v439_v61, 0.0  ;;  %v431_v10 = vadd.f32 %v430_v59, %v373_v8 }
 0x332   :  { %v971_v60 = vpop.f32.mrf.mxu1 }
 0x333   :  { %v442_v62 = vadd.f32 %v971_v60, %v388_v56  ;;  %v445_v12 = vmax.f32 %v431_v10, 0.0 }
 0x334   :  { %v433_v5 = vpop.f32.mrf.mxu1 }
 0x335   :  { %v448_v6 = vmax.f32 %v442_v62, 0.0  ;;  %v434_v7 = vadd.f32 %v433_v5, %v378_v63 }
 0x337   :  { %973 = vmatpush3.msra.mxu1 %v448_v6  ;;  %v446_v11 = vmax.f32 %v434_v7, 0.0 }
 0x338   :  { %974 = vmatprep.subr.mxu1 %v1038_v0 }
 0x339   :  { %975 = vmatpush3.msra.mxu1 %v447_v9 }
 0x33a   :  { %976 = vmatprep.subr.mxu1 %v1038_v0 }
 0x33b   :  { %977 = vmatpush3.msra.mxu1 %v446_v11 }
 0x33c   :  { %978 = vmatprep.subr.mxu1 %v1038_v0 }
 0x33d   :  { %979 = vmatpush3.msra.mxu1 %v445_v12 }
 0x33e   :  { %981 = vmatmul.mubr.msk.f32.vlgmr.msra.gmra.mxu1 %vm266_vm4, %v449_v13  ;;  %995 = vmatprep.subr.mxu1 %v1038_v0 }
 0x33f   :  { %997 = vmatprep.mubr.msk.f32.mxu1 %vm1039_vm0, %v1038_v0 }
 0x3fe   :  { %v519_v14 = vpop.f32.mrf.mxu1 }
 0x3ff   :  { %v523_v15 = vpack.c.bf16 %v519_v14, %v519_v14 }
 0x400   :  { %v982_v16 = vpop.f32.mrf.mxu1 }
 0x401   :  { %992 = vmatmul.mubr.msk.bf16.vlgmr.msra.gmra.mxu0 %vm88_vm1, %v523_v15 }
 0x402   :  { %1014 = vmatprep.mubr.msk.f32.mxu0 %vm1039_vm0, %v1038_v0 }
 0x4c1   :  { %v567_v18 = vpop.f32.mrf.mxu0 }
 0x4c2   :  { %v568_v19 = vadd.f32 %v567_v18, %v528_v17 }
 0x4c3   :  { %v993_v20 = vpop.f32.mrf.mxu0 }
 0x4c4   :  { %v573_v21 = vmax.f32 %v568_v19, 0.0 }
 0x4c5   :  { %v570_v23 = vpop.f32.mrf.mxu0 }
 0x4c6   :  { %996 = vmatpush3.msra.mxu1 %v573_v21 }
 0x4c7   :  { %v994_v24 = vpop.f32.mrf.mxu0  ;;  %998 = vmatmul.mubr.msk.f32.vlgmr.msra.gmra.mxu1 %vm575_vm5, %v574_v22  ;;  %1000 = vmatprep.subr.bf16.mxu1 %v1038_v0 }
 0x4c8   :  { %1001 = vmatpush3.bf16.msra.mxu1 %v1120_v1  ;;  %1008 = vmatprep.mubr.msk.bf16.mxu1 %vm1039_vm0, %v1038_v0 }
 0x4c9   :  { %1002 = vmatprep.subr.bf16.mxu1 %v1038_v0 }
 0x4cc   :  { %1003 = vmatpush3.bf16.msra.mxu1 %v1128_v2 }
 0x4cd   :  { %1004 = vmatprep.subr.bf16.mxu1 %v1038_v0 }
 0x4d0   :  { %1005 = vmatpush3.bf16.msra.mxu1 %v1135_v3 }
 0x4d1   :  { %1006 = vmatprep.subr.bf16.mxu1 %v1038_v0 }
 0x4d4   :  { %1007 = vmatpush3.bf16.msra.mxu1 %v1142_v4 }
 0x587   :  { %v645_v25 = vpop.f32.mrf.mxu1 }
 0x588   :  { %v649_v26 = vpack.c.bf16 %v645_v25, %v645_v25 }
 0x589   :  { %v999_v27 = vpop.f32.mrf.mxu1 }
 0x58a   :  { %1009 = vmatmul.mubr.msk.bf16.vlgmr.msra.gmra.mxu1 %vm88_vm1, %v649_v26 }
 0x64a   :  { %v693_v29 = vpop.f32.mrf.mxu1 }
 0x64b   :  { %v694_v30 = vadd.f32 %v693_v29, %v654_v28 }
 0x64c   :  { %v1010_v31 = vpop.f32.mrf.mxu1 }
 0x64d   :  { %v699_v32 = vmax.f32 %v694_v30, 0.0 }
 0x64e   :  { %v696_v34 = vpop.f32.mrf.mxu1 }
 0x64f   :  { %1013 = vmatpush3.msra.mxu0 %v699_v32 }
 0x650   :  { %v1011_v35 = vpop.f32.mrf.mxu1  ;;  %1015 = vmatmul.mubr.msk.f32.vlgmr.msra.gmra.mxu0 %vm575_vm5, %v700_v33  ;;  %1017 = vmatprep.subr.bf16.mxu0 %v1038_v0 }
 0x651   :  { %1018 = vmatpush3.bf16.msra.mxu0 %v1120_v1  ;;  %1025 = vmatprep.mubr.msk.bf16.mxu0 %vm1039_vm0, %v1038_v0  ;;  %v779_v1 = vpop.permute.xlu0 %778 }
 0x652   :  { %1019 = vmatprep.subr.bf16.mxu0 %v1038_v0 }
 0x655   :  { %1020 = vmatpush3.bf16.msra.mxu0 %v1128_v2  ;;  %v843_v51 = vpop.permute.xlu0 %842 }
 0x656   :  { %1021 = vmatprep.subr.bf16.mxu0 %v1038_v0  ;;  %v848_v53 = vrot.slane %v843_v51, %v847_v49 }
 0x659   :  { %1022 = vmatpush3.bf16.msra.mxu0 %v1135_v3 }
 0x65a   :  { %1023 = vmatprep.subr.bf16.mxu0 %v1038_v0 }
 0x65d   :  { %1024 = vmatpush3.bf16.msra.mxu0 %v1142_v4 }
 0x710   :  { %v770_v36 = vpop.f32.mrf.mxu0 }
 0x711   :  { %v774_v37 = vpack.c.bf16 %v770_v36, %v770_v36 }
 0x712   :  { %v1016_v38 = vpop.f32.mrf.mxu0 }
 0x713   :  { %1026 = vmatmul.mubr.msk.bf16.vlgmr.msra.gmra.mxu0 %vm88_vm1, %v774_v37 }
 0x7d3   :  { %v818_v39 = vpop.f32.mrf.mxu0 }
 0x7d4   :  { %v819_v40 = vadd.f32 %v818_v39, %v779_v1 }
 0x7d5   :  { %v1027_v41 = vpop.f32.mrf.mxu0 }
 0x7d6   :  { %v824_v42 = vmax.f32 %v819_v40, 0.0 }
 0x7d7   :  { %v821_v2 = vpop.f32.mrf.mxu0 }
 0x7d8   :  { %v831_v44 = vmul.f32 %v829_v43, %v824_v42 }
 0x7d9   :  { %v1028_v46 = vpop.f32.mrf.mxu0 }
 0x7da   :  { %v832_v3 = vsel %vm88_vm1, %v831_v44, 0.0 }
 0x7db   :  { %v833_v0 = vrot.slane %v832_v3, 4 }
 0x7dd   :  { %v834_v4 = vadd.f32 %v833_v0, %v832_v3 }
 0x7df   :  { %v835_v48 = vrot.slane %v834_v4, 2 }
 0x7e1   :  { %v836_v50 = vadd.f32 %v835_v48, %v834_v4 }
 0x7e3   :  { %v837_v52 = vrot.slane %v836_v50, 1 }
 0x7e5   :  { %v838_v54 = vadd.f32 %v837_v52, %v836_v50 }
 0x7e7   :  { %v849_v55 = vadd.f32 %v848_v53, %v838_v54 }
 0x7e9   :  { %851 = vst.msk [vmem:[%s1306_s14] sm:$0x1] %vm850_vm6, %v849_v55 }

</bundles_post_ra>
